<compile_context>
chip_gen: v7x
topology: tpu7x:2x2x1
jax: 0.10.0
libtpu: 0.0.40
codegen_flags: <defaults>
</compile_context>

<pallas_src>
import functools

import jax
import jax.numpy as jnp
from jax import lax
from jax.experimental import pallas as pl
from jax.experimental.pallas import tpu as pltpu


def _dice_partial_kernel(x_ref, t_ref, out_ref, inter_acc, isq_acc, osq_acc,
                         *, classes, hw, tile_hw, k_per_split, ignore_index,
                         activation, need_mask):
    # x_ref   : (1, C, T_HW)   input dtype (cast to f32 in-register)
    # t_ref   : (1, 1, T_HW)   uint8/int32 labels
    # out_ref : (1, 1, C, 3)   f32 partial sums [inter, x^2, onehot^2]
    # *_acc   : (C, 1)         f32 VMEM accumulators, persistent across k
    k = pl.program_id(2)

    @pl.when(k == 0)
    def _():
        inter_acc[...] = jnp.zeros_like(inter_acc)
        isq_acc[...] = jnp.zeros_like(isq_acc)
        osq_acc[...] = jnp.zeros_like(osq_acc)

    x = x_ref[0].astype(jnp.float32)          # (C, T_HW)
    t = t_ref[0].astype(jnp.int32)            # (1, T_HW)

    keep = t != ignore_index                  # (1, T_HW) bool
    if need_mask:                             # static: padded / clipped tiles exist
        g = pl.program_id(0) * k_per_split + k          # intended global HW tile
        pos = g * tile_hw + lax.broadcasted_iota(jnp.int32, (1, tile_hw), 1)
        keep = jnp.logical_and(keep, pos < hw)

    # Fused per-pixel activation.  Garbage columns (clipped / duplicated DMA)
    # cannot leak: softmax is per-column and masked columns are zeroed below.
    if activation == "softmax":
        x = x - jnp.max(x, axis=0, keepdims=True)
        x = jnp.exp(x)
        x = x * pl.reciprocal(jnp.sum(x, axis=0, keepdims=True))
    elif activation == "sigmoid":
        x = jax.nn.sigmoid(x)
    elif callable(activation):
        x = activation(x)   # TODO(synk): only valid for strictly per-pixel callables

    # Single select folds ignore mask + HW tail + garbage sanitization.
    x = jnp.where(keep, x, 0.0)                                   # (C, T_HW)
    t_safe = jnp.where(keep, t, -1)                               # (1, T_HW)
    class_ids = lax.broadcasted_iota(jnp.int32, (classes, tile_hw), 0)
    onehot = (class_ids == t_safe).astype(jnp.float32)            # (C, T_HW)

    inter_acc[...] += jnp.sum(x * onehot, axis=1, keepdims=True)  # (C, 1)
    isq_acc[...] += jnp.sum(x * x, axis=1, keepdims=True)         # (C, 1)
    osq_acc[...] += jnp.sum(onehot, axis=1, keepdims=True)        # (C, 1)

    @pl.when(k == pl.num_programs(2) - 1)
    def _():
        out_ref[...] = jnp.concatenate(
            [inter_acc[...], isq_acc[...], osq_acc[...]], axis=1)[None, None]


def _vmem_budgets():
    """(tile-sizing budget, vmem_limit cap) derived from the chip's VMEM."""
    try:
        phys = int(pltpu.get_tpu_info().vmem_capacity_bytes)
    except Exception:
        phys = 64 * 2**20                       # conservative (v7x) fallback
    if phys <= 64 * 2**20:                      # v7x-class: 64 MiB per TensorCore
        return 20 * 2**20, 40 * 2**20
    return 32 * 2**20, 64 * 2**20               # v5e / v6e: 128 MiB physical


def _choose_tile_hw(classes, hw, x_itemsize, tile_budget):
    """Largest 128-aligned lane tile (<=32K) fitting the per-chip VMEM budget."""
    hw_pad = pl.cdiv(hw, 128) * 128
    if x_itemsize >= 4:
        c_pad = pl.cdiv(classes, 8) * 8         # f32 sublane padding
    elif x_itemsize == 2:
        c_pad = pl.cdiv(classes, 16) * 16       # bf16 packs 16 rows / vreg
    else:
        c_pad = pl.cdiv(classes, 32) * 32
    # Per-lane VMEM bytes: double-buffered x tile (sublane-padded), double-
    # buffered label tile (<=32 padded sublanes of 1B == 8 of 4B), and ~4
    # fused f32 tile temporaries (Mosaic fuses most elementwise producers).
    per_lane = 2 * c_pad * x_itemsize + 64 + 4 * c_pad * 4
    t = max(128, (tile_budget // per_lane) // 128 * 128)
    return int(min(t, 32768, hw_pad)), int(c_pad)


def dice_per_class(x_nchw, target_nhw, classes, ignore_index=255,
                   activation=None, *, tile_hw=None, hw_splits=None,
                   denom_eps=0.0):
    """Per-class dice of shape (N, C) via the tiled Pallas reduction kernel."""
    N, C, H, W = x_nchw.shape
    assert C == classes
    HW = H * W

    x = x_nchw.reshape(N, C, HW)                 # free reshape, keep dtype

    # Label stream at 1 B/px when the values fit in uint8 (4x less HBM traffic).
    if classes <= 256 and 0 <= ignore_index <= 255:
        t = target_nhw.astype(jnp.uint8).reshape(N, 1, HW)
    else:
        t = target_nhw.astype(jnp.int32).reshape(N, 1, HW)

    tile_budget, limit_cap = _vmem_budgets()
    if tile_hw is None:
        t_hw, c_pad = _choose_tile_hw(C, HW, x.dtype.itemsize, tile_budget)
    else:
        t_hw = int(tile_hw)
        assert t_hw % 128 == 0, "tile_hw must be a multiple of 128"
        c_pad = pl.cdiv(C, 8) * 8
    k_real = pl.cdiv(HW, t_hw)                   # number of real HW tiles

    # Split the HW reduction so a batch-1 call can occupy both v7x TensorCores
    # (no-op concern on single-TC v5e/v6e: just one extra tiny grid step).
    if hw_splits is not None:
        splits = max(1, int(hw_splits))
    elif N == 1 and k_real >= 2:
        splits = 2
    else:
        splits = 1
    k_per = pl.cdiv(k_real, splits)
    need_mask = (splits * k_per * t_hw) != HW    # tail / padded / duplicated tiles
    last_blk = k_real - 1

    kernel = functools.partial(
        _dice_partial_kernel, classes=C, hw=HW, tile_hw=t_hw,
        k_per_split=k_per, ignore_index=ignore_index,
        activation=activation, need_mask=need_mask)

    cost = pl.CostEstimate(
        flops=int(6 * N * C * HW),
        transcendentals=int(N * C * HW) if activation is not None else 0,
        bytes_accessed=int(x.size * x.dtype.itemsize
                           + t.size * t.dtype.itemsize
                           + splits * N * C * 3 * 4))

    vmem_est = (2 * c_pad * t_hw * x.dtype.itemsize   # double-buffered x tiles
                + 64 * t_hw                           # double-buffered label tiles
                + 4 * c_pad * t_hw * 4                # fused f32 temporaries
                + (1 << 20))
    vmem_limit = int(min(max(2 * vmem_est, 24 * 2**20), limit_cap))

    # Padded tiles of the split (intended index > last real tile) are clamped
    # to the last real block; their data is fully masked in-kernel via `pos`.
    def x_map(s, n, k):
        return (n, 0, jnp.minimum(s * k_per + k, last_blk))

    def t_map(s, n, k):
        return (n, 0, jnp.minimum(s * k_per + k, last_blk))

    parts = pl.pallas_call(
        kernel,
        out_shape=jax.ShapeDtypeStruct((splits, N, C, 3), jnp.float32),
        grid_spec=pltpu.PrefetchScalarGridSpec(
            num_scalar_prefetch=0,
            grid=(splits, N, k_per),
            in_specs=[
                pl.BlockSpec((1, C, t_hw), x_map),
                pl.BlockSpec((1, 1, t_hw), t_map),
            ],
            # Same output block across k -> written once, at the final k.
            out_specs=pl.BlockSpec((1, 1, C, 3), lambda s, n, k: (s, n, 0, 0)),
            scratch_shapes=[
                pltpu.VMEM((C, 1), jnp.float32),
                pltpu.VMEM((C, 1), jnp.float32),
                pltpu.VMEM((C, 1), jnp.float32),
            ],
        ),
        compiler_params=pltpu.CompilerParams(
            dimension_semantics=("parallel", "parallel", "arbitrary"),
            vmem_limit_bytes=vmem_limit),
        cost_estimate=cost,
    )(x, t)

    # Tiny JAX epilogue: combine HW splits and do the dice division.
    parts = parts.sum(axis=0)                            # (N, C, 3)
    inter, isq, osq = parts[..., 0], parts[..., 1], parts[..., 2]
    # denom_eps=0.0 keeps exact parity with the PyTorch reference; a class that
    # is absent AND whose activation output sums to zero yields NaN there too.
    return 2.0 * inter / (isq + osq + denom_eps)         # (N, C)


def dice_loss(x_nchw, target_nhw, classes, ignore_index=255,
              loss_mode="negative_log", activation=None,
              tile_hw=None, hw_splits=None):
    """JAX/Pallas equivalent of DiceLoss.forward."""
    if activation is not None and not (
            activation in ("softmax", "sigmoid") or callable(activation)):
        raise ValueError("activation must be None, 'softmax', 'sigmoid' or a callable")
    dice_nc = dice_per_class(x_nchw, target_nhw, classes, ignore_index,
                             activation, tile_hw=tile_hw, hw_splits=hw_splits)
    score = dice_nc.mean(axis=1)                                         # (N,)
    if loss_mode == "negative_log":
        eps = 1e-12
        return (-jnp.log(score + eps)).mean()
    elif loss_mode == "one_minus":
        return (1.0 - score).mean()
    else:
        raise ValueError("Loss mode unknown. Please use 'negative_log' or 'one_minus'!")


def _dice_loss_ref(x, t, classes, ignore_index=255,
                   loss_mode="negative_log", activation=None):
    """Pure-JAX reference mirroring the PyTorch code, for verification."""
    x = x.astype(jnp.float32)
    if activation == "softmax":
        x = jax.nn.softmax(x, axis=1)
    elif activation == "sigmoid":
        x = jax.nn.sigmoid(x)
    elif callable(activation):
        x = activation(x)
    t = t.astype(jnp.int32)[:, None]                       # (N,1,H,W)
    valid = (t != ignore_index).astype(jnp.float32)
    t = jnp.where(t == ignore_index, 0, t)
    onehot = (jnp.arange(classes)[None, :, None, None] == t).astype(jnp.float32)
    onehot = onehot * valid
    x = x * valid
    dice = 2 * (x * onehot).sum((2, 3)) / ((x ** 2).sum((2, 3)) + (onehot ** 2).sum((2, 3)))
    score = dice.mean(axis=1)
    if loss_mode == "negative_log":
        return (-jnp.log(score + 1e-12)).mean()
    return (1.0 - score).mean()


if __name__ == "__main__":
    key = jax.random.PRNGKey(0)
    kx, kt, kx2, kt2, kx3, kt3 = jax.random.split(key, 6)

    # --- Test 1: aligned spatial size, no activation, both loss modes. ---
    N, C, H, W = 2, 4, 16, 16
    x = jax.random.uniform(kx, (N, C, H, W), dtype=jnp.float32)
    target = jax.random.randint(kt, (N, H, W), 0, C, dtype=jnp.int32)
    target = target.at[:, :2, :].set(255)          # ignored band (ignore_index=255)

    loss = jax.block_until_ready(dice_loss(x, target, classes=C))
    ref = _dice_loss_ref(x, target, C)
    assert jnp.allclose(loss, ref, rtol=1e-5, atol=1e-6), (loss, ref)

    loss1m = jax.block_until_ready(
        dice_loss(x, target, classes=C, loss_mode="one_minus"))
    ref1m = _dice_loss_ref(x, target, C, loss_mode="one_minus")
    assert jnp.allclose(loss1m, ref1m, rtol=1e-5, atol=1e-6), (loss1m, ref1m)

    # --- Test 2: fused softmax activation (reciprocal-normalized in-kernel). ---
    loss_sm = jax.block_until_ready(
        dice_loss(x, target, classes=C, activation="softmax"))
    ref_sm = _dice_loss_ref(x, target, C, activation="softmax")
    assert jnp.allclose(loss_sm, ref_sm, rtol=1e-4, atol=1e-6), (loss_sm, ref_sm)

    # --- Test 3: odd spatial size (HW not 128-aligned) -> in-kernel tail mask. ---
    N2, C2, H2, W2 = 2, 3, 45, 47                  # HW = 2115
    x2 = jax.random.uniform(kx2, (N2, C2, H2, W2), dtype=jnp.float32)
    target2 = jax.random.randint(kt2, (N2, H2, W2), 0, C2, dtype=jnp.int32)
    target2 = target2.at[:, 0, :].set(255)
    loss2 = jax.block_until_ready(dice_loss(x2, target2, classes=C2))
    ref2 = _dice_loss_ref(x2, target2, C2)
    assert jnp.allclose(loss2, ref2, rtol=1e-4, atol=1e-6), (loss2, ref2)

    # --- Test 4: batch-1 core-split path (forced small tile + 2 HW splits). ---
    # Exercises multi-tile accumulation, split combination in the epilogue and
    # the block-index clamp / full masking of padded tiles.
    N3, C3, H3, W3 = 1, 5, 38, 38                  # HW = 1444, tiles of 512
    x3 = jax.random.uniform(kx3, (N3, C3, H3, W3), dtype=jnp.float32)
    target3 = jax.random.randint(kt3, (N3, H3, W3), 0, C3, dtype=jnp.int32)
    target3 = target3.at[:, :3, :].set(255)
    loss3 = jax.block_until_ready(
        dice_loss(x3, target3, classes=C3, tile_hw=512, hw_splits=2))
    ref3 = _dice_loss_ref(x3, target3, C3)
    assert jnp.allclose(loss3, ref3, rtol=1e-4, atol=1e-6), (loss3, ref3)

    print("KERNEL_OK")
</pallas_src>

<mosaic_0001>
module attributes {stable_mosaic.version = 11 : i64} {
  func.func @_dice_partial_kernel(%arg0: i32, %arg1: i32, %arg2: i32, %arg3: memref<1x4x256xf32, #tpu.memory_space<vmem>>, %arg4: memref<1x1x256xi8, #tpu.memory_space<vmem>>, %arg5: memref<1x1x4x3xf32, #tpu.memory_space<vmem>>, %arg6: memref<4x1xf32, #tpu.memory_space<vmem>>, %arg7: memref<4x1xf32, #tpu.memory_space<vmem>>, %arg8: memref<4x1xf32, #tpu.memory_space<vmem>>) attributes {dimension_semantics = [#tpu.dimension_semantics<parallel>, #tpu.dimension_semantics<parallel>, #tpu.dimension_semantics<arbitrary>], iteration_bounds = array<i64: 1, 2, 1>, scalar_prefetch = 0 : i64, scratch_operands = 3 : i64, tpu.core_type = #tpu.core_type<tc>, window_params = [{transform_indices = @transform_0, window_bounds = array<i64: 1, 4, 256>}, {transform_indices = @transform_1, window_bounds = array<i64: 1, 1, 256>}, {transform_indices = @transform_2, window_bounds = array<i64: 1, 1, 4, 3>}]} {
    %c0_i32 = arith.constant 0 : i32
    %0 = arith.cmpi eq, %arg2, %c0_i32 : i32
    %1 = arith.extui %0 : i1 to i32
    %c0_i32_0 = arith.constant 0 : i32
    %2 = arith.cmpi ne, %1, %c0_i32_0 : i32
    scf.if %2 {
      %cst_23 = arith.constant 0.000000e+00 : f32
      %41 = vector.broadcast %cst_23 : f32 to vector<4x1xf32>
      %c0_24 = arith.constant 0 : index
      %c0_25 = arith.constant 0 : index
      %42 = vector.load %arg6[%c0_24, %c0_25] : memref<4x1xf32, #tpu.memory_space<vmem>>, vector<4x1xf32>
      tpu.vector_store %arg6[%c0_24, %c0_25], %41 {strides = array<i32>} : memref<4x1xf32, #tpu.memory_space<vmem>>, vector<4x1xf32>,
      %cst_26 = arith.constant 0.000000e+00 : f32
      %43 = vector.broadcast %cst_26 : f32 to vector<4x1xf32>
      %c0_27 = arith.constant 0 : index
      %c0_28 = arith.constant 0 : index
      %44 = vector.load %arg7[%c0_27, %c0_28] : memref<4x1xf32, #tpu.memory_space<vmem>>, vector<4x1xf32>
      tpu.vector_store %arg7[%c0_27, %c0_28], %43 {strides = array<i32>} : memref<4x1xf32, #tpu.memory_space<vmem>>, vector<4x1xf32>,
      %cst_29 = arith.constant 0.000000e+00 : f32
      %45 = vector.broadcast %cst_29 : f32 to vector<4x1xf32>
      %c0_30 = arith.constant 0 : index
      %c0_31 = arith.constant 0 : index
      %46 = vector.load %arg8[%c0_30, %c0_31] : memref<4x1xf32, #tpu.memory_space<vmem>>, vector<4x1xf32>
      tpu.vector_store %arg8[%c0_30, %c0_31], %45 {strides = array<i32>} : memref<4x1xf32, #tpu.memory_space<vmem>>, vector<4x1xf32>,
    } else {
    }
    %c0 = arith.constant 0 : index
    %c0_1 = arith.constant 0 : index
    %c0_2 = arith.constant 0 : index
    %3 = vector.load %arg3[%c0, %c0_1, %c0_2] : memref<1x4x256xf32, #tpu.memory_space<vmem>>, vector<1x4x256xf32>
    %4 = vector.shape_cast %3 : vector<1x4x256xf32> to vector<4x256xf32>
    %c0_3 = arith.constant 0 : index
    %c0_4 = arith.constant 0 : index
    %c0_5 = arith.constant 0 : index
    %5 = vector.load %arg4[%c0_3, %c0_4, %c0_5] : memref<1x1x256xi8, #tpu.memory_space<vmem>>, vector<1x1x256xi8>
    %6 = vector.shape_cast %5 : vector<1x1x256xi8> to vector<1x256xi8>
    %7 = arith.extui %6 : vector<1x256xi8> to vector<1x256xi32>
    %c255_i32 = arith.constant 255 : i32
    %8 = vector.broadcast %c255_i32 : i32 to vector<1x256xi32>
    %9 = arith.cmpi ne, %7, %8 : vector<1x256xi32>
    %cst = arith.constant 0.000000e+00 : f32
    %10 = vector.shape_cast %9 : vector<1x256xi1> to vector<1x256xi1>
    %11 = vector.broadcast %10 : vector<1x256xi1> to vector<4x256xi1>
    %12 = vector.broadcast %cst : f32 to vector<4x256xf32>
    %13 = arith.select %11, %4, %12 : vector<4x256xi1>, vector<4x256xf32>
    %c-1_i32 = arith.constant -1 : i32
    %14 = vector.broadcast %c-1_i32 : i32 to vector<1x256xi32>
    %15 = arith.select %9, %7, %14 : vector<1x256xi1>, vector<1x256xi32>
    %16 = tpu.iota {dimensions = array<i32: 0>} : vector<4x256xi32>
    %17 = vector.broadcast %15 : vector<1x256xi32> to vector<4x256xi32>
    %18 = arith.cmpi eq, %16, %17 : vector<4x256xi32>
    %19 = arith.extui %18 : vector<4x256xi1> to vector<4x256xi32>
    %20 = arith.sitofp %19 : vector<4x256xi32> to vector<4x256xf32>
    %c0_6 = arith.constant 0 : index
    %c0_7 = arith.constant 0 : index
    %21 = vector.load %arg6[%c0_6, %c0_7] : memref<4x1xf32, #tpu.memory_space<vmem>>, vector<4x1xf32>
    %22 = arith.mulf %13, %20 : vector<4x256xf32>
    %cst_8 = arith.constant dense<0.000000e+00> : vector<4xf32>
    %23 = vector.multi_reduction <add>, %22, %cst_8 [1] : vector<4x256xf32> to vector<4xf32>
    %24 = vector.shape_cast %23 : vector<4xf32> to vector<4x1xf32>
    %25 = arith.addf %21, %24 : vector<4x1xf32>
    %c0_9 = arith.constant 0 : index
    %c0_10 = arith.constant 0 : index
    %26 = vector.load %arg6[%c0_9, %c0_10] : memref<4x1xf32, #tpu.memory_space<vmem>>, vector<4x1xf32>
    tpu.vector_store %arg6[%c0_9, %c0_10], %25 {strides = array<i32>} : memref<4x1xf32, #tpu.memory_space<vmem>>, vector<4x1xf32>,
    %c0_11 = arith.constant 0 : index
    %c0_12 = arith.constant 0 : index
    %27 = vector.load %arg7[%c0_11, %c0_12] : memref<4x1xf32, #tpu.memory_space<vmem>>, vector<4x1xf32>
    %28 = arith.mulf %13, %13 : vector<4x256xf32>
    %cst_13 = arith.constant dense<0.000000e+00> : vector<4xf32>
    %29 = vector.multi_reduction <add>, %28, %cst_13 [1] : vector<4x256xf32> to vector<4xf32>
    %30 = vector.shape_cast %29 : vector<4xf32> to vector<4x1xf32>
    %31 = arith.addf %27, %30 : vector<4x1xf32>
    %c0_14 = arith.constant 0 : index
    %c0_15 = arith.constant 0 : index
    %32 = vector.load %arg7[%c0_14, %c0_15] : memref<4x1xf32, #tpu.memory_space<vmem>>, vector<4x1xf32>
    tpu.vector_store %arg7[%c0_14, %c0_15], %31 {strides = array<i32>} : memref<4x1xf32, #tpu.memory_space<vmem>>, vector<4x1xf32>,
    %c0_16 = arith.constant 0 : index
    %c0_17 = arith.constant 0 : index
    %33 = vector.load %arg8[%c0_16, %c0_17] : memref<4x1xf32, #tpu.memory_space<vmem>>, vector<4x1xf32>
    %cst_18 = arith.constant dense<0.000000e+00> : vector<4xf32>
    %34 = vector.multi_reduction <add>, %20, %cst_18 [1] : vector<4x256xf32> to vector<4xf32>
    %35 = vector.shape_cast %34 : vector<4xf32> to vector<4x1xf32>
    %36 = arith.addf %33, %35 : vector<4x1xf32>
    %c0_19 = arith.constant 0 : index
    %c0_20 = arith.constant 0 : index
    %37 = vector.load %arg8[%c0_19, %c0_20] : memref<4x1xf32, #tpu.memory_space<vmem>>, vector<4x1xf32>
    tpu.vector_store %arg8[%c0_19, %c0_20], %36 {strides = array<i32>} : memref<4x1xf32, #tpu.memory_space<vmem>>, vector<4x1xf32>,
    %c0_i32_21 = arith.constant 0 : i32
    %38 = arith.cmpi eq, %arg2, %c0_i32_21 : i32
    %39 = arith.extui %38 : i1 to i32
    %c0_i32_22 = arith.constant 0 : i32
    %40 = arith.cmpi ne, %39, %c0_i32_22 : i32
    scf.if %40 {
      %c0_23 = arith.constant 0 : index
      %c0_24 = arith.constant 0 : index
      %41 = vector.load %arg6[%c0_23, %c0_24] : memref<4x1xf32, #tpu.memory_space<vmem>>, vector<4x1xf32>
      %c0_25 = arith.constant 0 : index
      %c0_26 = arith.constant 0 : index
      %42 = vector.load %arg7[%c0_25, %c0_26] : memref<4x1xf32, #tpu.memory_space<vmem>>, vector<4x1xf32>
      %c0_27 = arith.constant 0 : index
      %c0_28 = arith.constant 0 : index
      %43 = vector.load %arg8[%c0_27, %c0_28] : memref<4x1xf32, #tpu.memory_space<vmem>>, vector<4x1xf32>
      %44 = tpu.concatenate %41, %42, %43 in 1 : vector<4x1xf32>, vector<4x1xf32>, vector<4x1xf32> -> vector<4x3xf32>
      %45 = vector.shape_cast %44 : vector<4x3xf32> to vector<1x1x4x3xf32>
      %c0_29 = arith.constant 0 : index
      %c0_30 = arith.constant 0 : index
      %c0_31 = arith.constant 0 : index
      %c0_32 = arith.constant 0 : index
      %46 = vector.load %arg5[%c0_29, %c0_30, %c0_31, %c0_32] : memref<1x1x4x3xf32, #tpu.memory_space<vmem>>, vector<1x1x4x3xf32>
      tpu.vector_store %arg5[%c0_29, %c0_30, %c0_31, %c0_32], %45 {strides = array<i32>} : memref<1x1x4x3xf32, #tpu.memory_space<vmem>>, vector<1x1x4x3xf32>,
    } else {
    }
    return
  }
  func.func @transform_0(%arg0: i32, %arg1: i32, %arg2: i32) -> (i32, i32, i32) {
    %c1_i32 = arith.constant 1 : i32
    %0 = arith.muli %arg0, %c1_i32 : i32
    %1 = arith.addi %0, %arg2 : i32
    %c0_i32 = arith.constant 0 : i32
    %2 = arith.minsi %1, %c0_i32 : i32
    %c0_i32_0 = arith.constant 0 : i32
    %c0_i32_1 = arith.constant 0 : i32
    return %arg1, %c0_i32_0, %2 : i32, i32, i32
  }
  func.func @transform_1(%arg0: i32, %arg1: i32, %arg2: i32) -> (i32, i32, i32) {
    %c1_i32 = arith.constant 1 : i32
    %0 = arith.muli %arg0, %c1_i32 : i32
    %1 = arith.addi %0, %arg2 : i32
    %c0_i32 = arith.constant 0 : i32
    %2 = arith.minsi %1, %c0_i32 : i32
    %c0_i32_0 = arith.constant 0 : i32
    %c0_i32_1 = arith.constant 0 : i32
    return %arg1, %c0_i32_0, %2 : i32, i32, i32
  }
  func.func @transform_2(%arg0: i32, %arg1: i32, %arg2: i32) -> (i32, i32, i32, i32) {
    %c0_i32 = arith.constant 0 : i32
    %c0_i32_0 = arith.constant 0 : i32
    %c0_i32_1 = arith.constant 0 : i32
    return %arg0, %arg1, %c0_i32, %c0_i32_0 : i32, i32, i32, i32
  }
}

</mosaic_0001>

<bundles_post_ra>
// kernel: tpu_custom_call.1
= control target key start
LH: loop header
LB: loop body
LE: loop exit
PB: predicated region body
PF: predicated region fallthrough
CT: control target
= control target key end

     0   :  { %7 = vsyncpa [#allocation6], 0  ;;  %s804_s0 = inlined_call_operand.hbm [shape: f32[2,4,256], index: 0, kind: input, shape index: {}]   ;;  %s805_s1 = inlined_call_operand.vmem [shape: u8[2,1,256], index: 1, kind: input, shape index: {}]   ;;  %s806_s2 = inlined_call_operand.vmem [shape: f32[1,2,4,3], index: 2, kind: output, shape index: {}]  }
   0x1   :  { %9 = vsyncpa [#allocation6 + $0x1], 0  ;;  %s660_s9 = smov 0   ;;  %s662_s10 = smov 0  }
   0x2   :  { %s664_s11 = smov 0   ;;  %s666_s12 = smov 0  }
   0x3   :  { %s668_s13 = smov 0   ;;  %s670_s14 = smov 0  }
   0x4 LB: > { %s482_s15 = sadd.s32 4294967295, %s638_s14   ;;  %s30_s16 = sadd.s32 1, %s634_s13  ;;  %s638_s14 = sphi %s670_s14, %s15_s14   ;;  %s634_s13 = sphi %s668_s13, %s816_s13   ;;  %s630_s12 = sphi %s666_s12, %s815_s12   ;;  %s626_s11 = sphi %s664_s11, %s814_s11   ;;  %s622_s10 = sphi %s662_s10, %s813_s10   ;;  %s618_s9 = sphi %s660_s9, %s812_s9  }
   0x5   : > { %p32_p0 = scmp.ge.s32.totalorder %s30_s16, 2  ;;  %s49_s17 = sadd.s32 1, %s626_s11 }
   0x6   : > { %p56_p1 = scmp.ne.s32.totalorder %s626_s11, %s622_s10  ;;  %p57_p2 = scmp.eq.s32.totalorder %s638_s14, 0 }
   0x7   : > { %s818_s16 = smov (%p32_p0, %s30_s16), 0  ;;  %p62_p4 = scmp.ne.s32.totalorder %s622_s10, %s618_s9 }
   0x8   : > { %p696_p3 = por %p57_p2, %p56_p1  ;;  %s44_s19 = ssub.s32 %s634_s13, %s818_s16 }
   0x9   : > { %p63_p5 = scmp.eq.s32.totalorder %s482_s15, 0  ;;  %p47_p6 = scmp.eq.s32.totalorder %s44_s19, 0 }
   0xa   : > { %p504_p8 = scmp.lt.s32.totalorder %s638_s14, 2  ;;  %s148_s22 = sand.u32 1, %s626_s11  }
   0xb   : > { %p703_p7 = por %p63_p5, %p62_p4  ;;  %s497_s23 = sshll.u32 %s634_s13, 7 }
   0xc   : > { %s709_s21 = scalar_select %p47_p6, %s626_s11, %s49_s17  }
   0xd   : > { %s486_s24 = sshll.u32 %s148_s22, 3  ;;  %s716_s27 = scalar_lea.hbm %s804_s0, %s497_s23 }
   0xe   : > { %s152_s28 = scalar_lea.vmem [#allocation5], %s486_s24  ;;  %p720_p9 = pnand %p504_p8, %p696_p3 }
   0xf   : > { %s165_s29 = sshll.u32 %s152_s28, 4  ;;  %s149_s3 = scalar_lea.sflag [#allocation6], %s148_s22  ;;  %s724_s29 = int_to_ptr.vmem [resolvable:$true] %s165_s29 }
  0x10   : > { %s558_s4 = scalar_lea.hbm %s716_s27, 128  ;;  %p560_p13 = pneg %p720_p9 }
  0x11   : > { %p559_p12 = scmp.ne.s32.totalorder %s716_s27, %s558_s4  ;;  %s563_s7 = scalar_lea.hbm %s804_s0, 256 }
  0x12   : > { %p564_p2 = scmp.lt.u32.totalorder %s716_s27, %s804_s0  ;;  %p565_p3 = scmp.lt.u32.totalorder %s563_s7, %s558_s4 }
  0x13   : > { %p561_p0 = pnand %p560_p13, %p559_p12  ;;  %p567_p5 = scmp.lt.u32.totalorder %s558_s4, %s716_s27 }
  0x14   : > { %p566_p4 = por %p565_p3, %p564_p2 }
  0x15   : > { %p562_p1 = pneg %p561_p0 }
  0x16   : > { %p568_p6 = por %p567_p5, %p566_p4 }
  0x18   : > { %p569_p8 = pnand %p568_p6, %p562_p1 }
  0x1a   : > { %572 = shalt.err (!%p569_p8)
}
  0x1b   : > { %s573_s15 = scalar_lea.vmem %s724_s29, 128  ;;  %s640_s17 = smov [#allocation5]  }
  0x1c   : > { %p574_p12 = scmp.ne.s32.totalorder %s724_s29, %s573_s15  ;;  %s578_s18 = sshll.u32 %s640_s17, 4  ;;  %s579_s18 = int_to_ptr.vmem [resolvable:$false] %s578_s18 }
  0x1d   : > { %s580_s19 = scalar_lea.vmem %s579_s18, 256  ;;  %p581_p11 = scmp.lt.s32.totalorder %s724_s29, %s579_s18 }
  0x1e   : > { %p576_p0 = pnand %p574_p12, %p560_p13  ;;  %p582_p2 = scmp.lt.s32.totalorder %s580_s19, %s573_s15 }
  0x20   : > { %p577_p10 = pneg %p576_p0  ;;  %p583_p3 = por %p582_p2, %p581_p11 }
  0x22   : > { %p584_p4 = pnand %p583_p3, %p577_p10 }
  0x24   : > { %587 = shalt.err (!%p584_p4)
}
  0x25   : > { %503 = dma.hbm_to_vmem [thread:$0]  (!%p720_p9), %s716_s27, 128, %s724_s29, %s149_s3  }
  0x26   : > { %p810_p1 = scmp.lt.s32.totalorder %s638_s14, 3  ;;  %p811_p5 = scmp.ge.s32.totalorder %s638_s14, 1 }
  0x28   : > { %p189_p13 = pnand %p811_p5, %p810_p1 }
  0x29   : > { %s194_s22 = sand.u32 (!%p189_p13), 1, %s622_s10  }
  0x2a   : > { %192 = sbr.rel (%p189_p13) target bundleno = 346 (0x15a), region = 28  ;;  %s490_s23 = sshll.u32 (!%p189_p13), %s194_s22, 3 }
  0x2b   : > { %s195_s24 = scalar_lea.sflag (!%p189_p13), [#allocation6], %s194_s22  ;;  %s198_s25 = scalar_lea.vmem (!%p189_p13), [#allocation5], %s490_s23 }
  0x31   : > { %613 = dma.done.wait (%p703_p7), %s195_s24, 128  }
  0x32   : > { %615 = vsyncadd (%p703_p7), %s195_s24, 4294967168  ;;  %p241_p10 = scmp.lt.s32.totalorder %s630_s12, 1  ;;  %vm264_vm0 = vcmask 3072   ;;  %v274_v0 = vlaneseq  ;;  %v641_v1 = vmov 0.0   ;;  %v268_v8 = vld [vmem:[%s198_s25] sm:$0xff]  ;;  %v642_v9 = vmov 0  }
  0x33   : > { %266 = vst.msk [vmem:[#allocation3] sm:$0xf] %vm264_vm0, %v641_v1  ;;  %265 = vst.msk [vmem:[#allocation2] sm:$0xf] %vm264_vm0, %v641_v1  ;;  %v293_v16 = vcombine.high %v268_v8, %v268_v8  ;;  %vm325_vm2 = vcmask 1043456   ;;  %s643_s29 = smov 1  }
  0x34   : > { %s820_s12 = smov (!%p241_p10, %s630_s12), 1  ;;  %267 = vst.msk [vmem:[#allocation4] sm:$0xf] %vm264_vm0, %v641_v1  ;;  %v275_v2 = vshrl.u32 %v274_v0, 7  ;;  %s644_s30 = smov 2   ;;  %vm366_vm7 = vcmask 7168  }
  0x35   : > { %s491_s26 = sshll.u32 %s820_s12, 1  ;;  %s492_s3 = sshll.u32 %s820_s12, 2  ;;  %vm368_vm8 = vcmask 15360   ;;  %vm370_vm9 = vcmask 19456  }
  0x36   : > { %s247_s20 = scalar_lea.vmem %s805_s1, %s491_s26  ;;  %v276_v6 = vsub.s32 0, %v275_v2  ;;  %v280_v7 = vsub.s32 4, %v275_v2  ;;  %s259_s6 = scalar_lea.vmem %s806_s2, %s492_s3 }
  0x37   : > { %v269_v3 = vld [vmem:[%s247_s20] sm:$0x3] }
  0x38   : > { %v270_v4 = vunpack.c.0.s8 %v269_v3 }
  0x3a   : > { %v271_v5 = vand.u32 255, %v270_v4  ;;  %v334_v38 = vld [vmem:[#allocation3] sm:$0xf]  ;;  %v322_v39 = vld [vmem:[#allocation2] sm:$0xf] }
  0x3b   : > { %v344_v43 = vld [vmem:[#allocation4] sm:$0xf] }
  0x3c   : > { %vm272_vm1 = vcmp.ne.s32.totalorder %v271_v5, 255 }
  0x3d   : > { %v273_v10 = vsel %vm272_vm1, 1, %v642_v9  ;;  %v297_v11 = vsel %vm272_vm1, %v271_v5, 4294967295 }
  0x3e   : > { %v277_v12 = vrot.slane %v273_v10, %v276_v6  ;;  %v281_v13 = vrot.slane %v273_v10, %v280_v7  ;;  %v303_v14 = vrot.slane %v297_v11, %v276_v6  ;;  %v307_v15 = vrot.slane %v297_v11, %v280_v7 }
  0x40   : > { %v285_v17 = vrot.slane %v277_v12, %v276_v6  ;;  %v289_v18 = vrot.slane %v281_v13, %v276_v6  ;;  %v311_v19 = vrot.slane %v303_v14, %v276_v6  ;;  %v315_v20 = vrot.slane %v307_v15, %v276_v6 }
  0x42   : > { %vm290_vm3 = vcmp.eq.s32.totalorder %v285_v17, 1  ;;  %vm291_vm4 = vcmp.eq.s32.totalorder %v289_v18, 1  ;;  %vm316_vm5 = vcmp.eq.s32.totalorder %v275_v2, %v311_v19  ;;  %vm317_vm6 = vcmp.eq.s32.totalorder %v275_v2, %v315_v20 }
  0x43   : > { %v295_v21 = vsel %vm290_vm3, %v268_v8, 0.0  ;;  %v296_v22 = vsel %vm291_vm4, %v293_v16, 0.0  ;;  %v493_v23 = vsel %vm316_vm5, 1.0, %v641_v1  ;;  %v494_v24 = vsel %vm317_vm6, 1.0, %v641_v1 }
  0x44   : > { %v335_v25 = vmul.f32 %v295_v21, %v295_v21  ;;  %v336_v26 = vmul.f32 %v296_v22, %v296_v22  ;;  %v323_v27 = vmul.f32 %v493_v23, %v295_v21  ;;  %v324_v28 = vmul.f32 %v494_v24, %v296_v22 }
  0x45   : > { %v345_v31 = vsel %vm325_vm2, %v493_v23, 0.0  ;;  %v346_v32 = vsel %vm325_vm2, %v494_v24, 0.0 }
  0x46   : > { %v337_v29 = vsel %vm325_vm2, %v335_v25, 0.0  ;;  %v338_v30 = vsel %vm325_vm2, %v336_v26, 0.0  ;;  %v326_v34 = vsel %vm325_vm2, %v323_v27, 0.0  ;;  %v327_v35 = vsel %vm325_vm2, %v324_v28, 0.0 }
  0x47   : > { %v339_v33 = vadd.f32 %v338_v30, %v337_v29  ;;  %v328_v36 = vadd.f32 %v327_v35, %v326_v34  ;;  %v347_v37 = vadd.f32 %v346_v32, %v345_v31 }
  0x49   : > { %340 = vadd.xlane.f32.xlu0 %v339_v33  ;;  %329 = vadd.xlane.f32.xlu1 %v328_v36 }
  0x4d   : > { %348 = vadd.xlane.f32.xlu0 %v347_v37 }
  0xd6   : > { %v341_v40 = vpop.xlane.xlu0 %340  ;;  %v330_v42 = vpop.xlane.xlu1 %329 }
  0xd7   : > { %v342_v41 = vadd.f32 %v341_v40, %v334_v38  ;;  %v331_v44 = vadd.f32 %v330_v42, %v322_v39 }
  0xd9   : > { %343 = vst.msk [vmem:[#allocation3] sm:$0xf] %vm264_vm0, %v342_v41  ;;  %333 = vst.msk [vmem:[#allocation2] sm:$0xf] %vm264_vm0, %v331_v44 }
  0xda   : > { %v349_v45 = vpop.xlane.xlu0 %348 }
  0xdb   : > { %v350_v46 = vadd.f32 %v349_v45, %v344_v43 }
  0xdd   : > { %351 = vst.msk [vmem:[#allocation4] sm:$0xf] %vm264_vm0, %v350_v46 }
  0xe0   : > { %v356_v47 = vld [vmem:[#allocation3] sm:$0xf]  ;;  %v355_v50 = vld [vmem:[#allocation2] sm:$0xf] }
  0xe1   : > { %359 = vrot.lane.b32.xlu1 %v356_v47, %s643_s29 }
  0xe4   : > { %v357_v48 = vld [vmem:[#allocation4] sm:$0xf] }
  0xe5   : > { %363 = vrot.lane.b32.xlu0 %v357_v48, %s644_s30 }
 0x153   : > { %v360_v49 = vpop.permute.xlu1 %359 }
 0x154   : > { %v367_v51 = vsel %vm366_vm7, %v355_v50, %v360_v49 }
 0x157   : > { %v364_v52 = vpop.permute.xlu0 %363 }
 0x158   : > { %v369_v53 = vsel %vm368_vm8, %v367_v51, %v364_v52 }
 0x159   : > { %371 = vst.msk [vmem:[%s259_s6] sm:$0xf] %vm370_vm9, %v369_v53 }
 0x15a PF: > { %s15_s14 = sadd.s32 1, %s638_s14   ;;  %s812_s9 = smov %s622_s10 }
 0x15b   : > { %p12_p7 = scmp.ge.s32.totalorder %s15_s14, 4   ;;  %s813_s10 = smov %s626_s11 }
 0x15c   : > { %s814_s11 = smov %s709_s21  ;;  %s815_s12 = smov %s634_s13 }
 0x15d   : > { %s816_s13 = smov %s818_s16  ;;  %14 = sbr.rel (!%p12_p7) target bundleno = 4 (0x4), region = 79 }
 0x164   :  { %399 = vsyncpa [#allocation6], 1 }
 0x165   :  { %401 = vsyncpa [#allocation6 + $0x1], 1 }

</bundles_post_ra>
